<compile_context>
chip_gen: v7x
topology: tpu7x:2x2x1
jax: 0.10.0
libtpu: 0.0.40
codegen_flags: <defaults>
</compile_context>

<pallas_src>
import functools
import math

import jax
import jax.numpy as jnp
import numpy as np
from jax import lax
from jax.experimental import pallas as pl
from jax.experimental.pallas import tpu as pltpu

_LANES = 128

# Class weights from the module's __init__ (deterministic, hard-coded).
_CLASS_WEIGHTS = jnp.array(
    [0.795, 0.799, 0.951, 0.882, 0.969, 0.978, 0.972,
     0.781, 0.62, 0.765, 0.992, 0.934, 0.954, 0.707],
    dtype=jnp.float32,
)


def _round_up(a, m):
    return ((a + m - 1) // m) * m


def _sublane(dtype):
    # Packed sublane granularity: 8 for f32, 16 for bf16/f16, 32 for int8/fp8.
    return 8 * max(1, 4 // jnp.dtype(dtype).itemsize)


def _num_tensorcores():
    # v7x has 2 TensorCores per chip; v5e/v6e have 1.  Best-effort detection;
    # falling back to 1 is always correct (perf-only choice).
    try:
        kind = (jax.devices()[0].device_kind or "").lower()
        if "v7" in kind:
            return 2
    except Exception:
        pass
    return 1


def _stable_bce(x, y):
    # Numerically stable BCE-with-logits, same formulation as torch:
    #   max(x, 0) - x*y + log1p(exp(-|x|))
    return jnp.maximum(x, 0.0) - x * y + jnp.log1p(jnp.exp(-jnp.abs(x)))


def _wbce_kernel(scores_ref, targets_ref, w_ref, out_ref, acc_ref, *,
                 tile_rows, tiles_per_part, rows_valid, row_period,
                 last_full_tiles, need_mask):
    """Accumulate raw BCE into a (row_period, 128) bucket; weights applied once."""
    p = pl.program_id(0)   # parallel partition (megacore axis)
    j = pl.program_id(1)   # sequential tile axis (reduction)

    @pl.when(j == 0)
    def _init():
        acc_ref[...] = jnp.zeros_like(acc_ref)

    x = scores_ref[...].astype(jnp.float32)   # (tile_rows, 128) logits
    y = targets_ref[...].astype(jnp.float32)  # (tile_rows, 128) targets
    bce = _stable_bce(x, y)

    groups = tile_rows // row_period

    def _bucketed(v):
        # Fold the tile onto the repeating weight period (pure VPU adds).
        if groups == 1:
            return v
        return v.reshape(groups, row_period, _LANES).sum(axis=0)

    tile_idx = p * tiles_per_part + j

    if need_mask:
        if last_full_tiles > 0:
            @pl.when(tile_idx < last_full_tiles)
            def _hot():                       # fully valid tiles: no mask work
                acc_ref[...] += _bucketed(bce)

        @pl.when(tile_idx >= last_full_tiles)
        def _edge():                          # partial / fully-padded tiles
            row0 = tile_idx * tile_rows
            rows = row0 + lax.broadcasted_iota(jnp.int32, bce.shape, 0)
            acc_ref[...] += _bucketed(jnp.where(rows < rows_valid, bce, 0.0))
    else:
        acc_ref[...] += _bucketed(bce)

    @pl.when(j == pl.num_programs(1) - 1)
    def _finalize():
        # Single weight multiply + cross-lane reduce per partition.
        out_ref[0, 0] = jnp.sum(acc_ref[...] * w_ref[...])


def weighted_logit_bce(scores, targets, weights=_CLASS_WEIGHTS, *,
                       max_tile_rows=7168, num_parts=None):
    """scores, targets: (B, C) arrays (f32 or bf16); returns scalar f32 loss."""
    b, c = scores.shape
    assert targets.shape == (b, c)
    total = b * c

    wf = jnp.asarray(weights, jnp.float32)
    assert wf.shape == (c,)

    # Weight-pattern geometry on the lane-dense (rows, 128) view: weights repeat
    # with a period of `row_period` rows (lcm of the sublane packing and
    # c / gcd(c, 128); 56 rows for f32 inputs with c = 14, 112 for bf16).
    r = c // math.gcd(c, _LANES)
    sub = max(_sublane(scores.dtype), _sublane(targets.dtype))
    row_period = (sub * r) // math.gcd(sub, r)

    # 128-aligned bulk goes through the kernel (copy-free reshape when possible,
    # otherwise a prefix slice); ragged tail (< 128 elems) is a pure-JAX epilogue.
    rows_valid = total // _LANES
    bulk = rows_valid * _LANES
    tail = total - bulk

    bulk_sum = jnp.float32(0.0)
    if rows_valid > 0:
        if tail == 0:
            s2 = scores.reshape(rows_valid, _LANES)
            t2 = targets.reshape(rows_valid, _LANES)
        else:
            s2 = lax.slice(scores.reshape(-1), (0,), (bulk,)).reshape(rows_valid, _LANES)
            t2 = lax.slice(targets.reshape(-1), (0,), (bulk,)).reshape(rows_valid, _LANES)

        tile_rows = min(_round_up(rows_valid, row_period),
                        max(row_period, (max_tile_rows // row_period) * row_period))
        tiles_valid = -(-rows_valid // tile_rows)

        parts = num_parts if num_parts is not None else _num_tensorcores()
        parts = max(1, min(parts, tiles_valid))
        tiles_total = _round_up(tiles_valid, parts)
        tiles_per_part = tiles_total // parts

        last_full_tiles = rows_valid // tile_rows     # tiles < this need no mask
        need_mask = tiles_total > last_full_tiles

        # Per-period weight block: w_blk[r, l] = weights[(r*128 + l) % c].
        # Constant index_map -> DMA'd once, resident for the whole grid.
        w_blk = jnp.tile(wf, (row_period * _LANES) // c).reshape(row_period, _LANES)

        last_block = tiles_valid - 1

        def data_map(pp, jj):
            # Clamp rounding-padded (fully out-of-range) tiles onto the last
            # valid block; their contribution is zeroed by the in-kernel mask.
            return (jnp.minimum(pp * tiles_per_part + jj, last_block), 0)

        kernel = functools.partial(
            _wbce_kernel,
            tile_rows=tile_rows, tiles_per_part=tiles_per_part,
            rows_valid=rows_valid, row_period=row_period,
            last_full_tiles=last_full_tiles, need_mask=need_mask)

        partials = pl.pallas_call(
            kernel,
            out_shape=jax.ShapeDtypeStruct((parts, 1), jnp.float32),
            grid_spec=pltpu.PrefetchScalarGridSpec(
                num_scalar_prefetch=0,
                grid=(parts, tiles_per_part),
                in_specs=[
                    pl.BlockSpec((tile_rows, _LANES), data_map),     # scores tile
                    pl.BlockSpec((tile_rows, _LANES), data_map),     # targets tile
                    pl.BlockSpec((row_period, _LANES),
                                 lambda pp, jj: (0, 0)),              # weights (resident)
                ],
                out_specs=pl.BlockSpec((1, 1), lambda pp, jj: (pp, 0),
                                       memory_space=pltpu.MemorySpace.SMEM),
                scratch_shapes=[pltpu.VMEM((row_period, _LANES), jnp.float32)],
            ),
            compiler_params=pltpu.CompilerParams(
                dimension_semantics=("parallel", "arbitrary"),
                vmem_limit_bytes=32 * 1024 * 1024),
            cost_estimate=pl.CostEstimate(
                flops=10 * total,
                transcendentals=2 * total,
                bytes_accessed=2 * total * jnp.dtype(scores.dtype).itemsize),
        )(s2, t2, w_blk)
        bulk_sum = jnp.sum(partials)

    tail_sum = jnp.float32(0.0)
    if tail > 0:
        ts = lax.slice(scores.reshape(-1), (bulk,), (total,)).astype(jnp.float32)
        tt = lax.slice(targets.reshape(-1), (bulk,), (total,)).astype(jnp.float32)
        tw = wf[(bulk + np.arange(tail)) % c]
        tail_sum = jnp.sum(_stable_bce(ts, tt) * tw)

    # sum(weighted BCE) / B  ==  mean(loss * weights) * C   (single normalization)
    return (bulk_sum + tail_sum) / jnp.float32(b)


def _reference(scores, targets, weights=_CLASS_WEIGHTS):
    x = scores.astype(jnp.float32)
    y = targets.astype(jnp.float32)
    w = jnp.asarray(weights, jnp.float32)
    return jnp.mean(_stable_bce(x, y) * w[None, :]) * scores.shape[1]


if __name__ == "__main__":
    key = jax.random.PRNGKey(0)
    k1, k2, k3, k4, k5, k6 = jax.random.split(key, 6)
    C = 14  # fixed by the module's weight vector

    # (1) f32, copy-free reshape path (B*C % 128 == 0), single masked edge tile.
    B1 = 64
    s1 = jax.random.normal(k1, (B1, C), dtype=jnp.float32) * 2.0
    t1 = (jax.random.uniform(k2, (B1, C)) > 0.5).astype(jnp.float32)
    out1 = jax.block_until_ready(weighted_logit_bce(s1, t1))
    ref1 = _reference(s1, t1)
    assert jnp.allclose(out1, ref1, rtol=1e-4, atol=1e-5), (out1, ref1)

    # (2) bf16 end-to-end: multiple tiles, 2 partitions, a rounding-padded tile
    #     (clamped index_map), a partial edge tile and a ragged pure-JAX tail.
    B2 = 2100
    s2 = (jax.random.normal(k3, (B2, C)) * 3.0).astype(jnp.bfloat16)
    t2 = (jax.random.uniform(k4, (B2, C)) > 0.5).astype(jnp.bfloat16)
    out2 = jax.block_until_ready(
        weighted_logit_bce(s2, t2, max_tile_rows=112, num_parts=2))
    ref2 = _reference(s2, t2)
    assert jnp.allclose(out2, ref2, rtol=1e-4, atol=1e-5), (out2, ref2)

    # (3) tiny batch (B*C < 128): pure-JAX epilogue only.
    B3 = 5
    s3 = jax.random.normal(k5, (B3, C), dtype=jnp.float32)
    t3 = (jax.random.uniform(k6, (B3, C)) > 0.5).astype(jnp.float32)
    out3 = jax.block_until_ready(weighted_logit_bce(s3, t3))
    ref3 = _reference(s3, t3)
    assert jnp.allclose(out3, ref3, rtol=1e-4, atol=1e-5), (out3, ref3)

    print("KERNEL_OK")
</pallas_src>

<mosaic_0001>
module attributes {stable_mosaic.version = 11 : i64} {
  func.func @_wbce_kernel(%arg0: i32, %arg1: i32, %arg2: memref<56x128xf32, #tpu.memory_space<vmem>>, %arg3: memref<56x128xf32, #tpu.memory_space<vmem>>, %arg4: memref<56x128xf32, #tpu.memory_space<vmem>>, %arg5: memref<1x1xf32, #tpu.memory_space<smem>>, %arg6: memref<56x128xf32, #tpu.memory_space<vmem>>) attributes {dimension_semantics = [#tpu.dimension_semantics<parallel>, #tpu.dimension_semantics<arbitrary>], iteration_bounds = array<i64: 1, 1>, scalar_prefetch = 0 : i64, scratch_operands = 1 : i64, tpu.core_type = #tpu.core_type<tc>, window_params = [{transform_indices = @transform_0, window_bounds = array<i64: 56, 128>}, {transform_indices = @transform_1, window_bounds = array<i64: 56, 128>}, {pipeline_mode = #tpu.pipeline_mode<synchronous>, transform_indices = @transform_2, window_bounds = array<i64: 56, 128>}, {transform_indices = @transform_3, window_bounds = array<i64: 1, 1>}]} {
    %c0_i32 = arith.constant 0 : i32
    %0 = arith.cmpi eq, %arg1, %c0_i32 : i32
    %1 = arith.extui %0 : i1 to i32
    %c0_i32_0 = arith.constant 0 : i32
    %2 = arith.cmpi ne, %1, %c0_i32_0 : i32
    scf.if %2 {
      %cst_9 = arith.constant 0.000000e+00 : f32
      %23 = vector.broadcast %cst_9 : f32 to vector<56x128xf32>
      %c0_10 = arith.constant 0 : index
      %c0_11 = arith.constant 0 : index
      %24 = vector.load %arg6[%c0_10, %c0_11] : memref<56x128xf32, #tpu.memory_space<vmem>>, vector<56x128xf32>
      tpu.vector_store %arg6[%c0_10, %c0_11], %23 {strides = array<i32>} : memref<56x128xf32, #tpu.memory_space<vmem>>, vector<56x128xf32>,
    } else {
    }
    %c0 = arith.constant 0 : index
    %c0_1 = arith.constant 0 : index
    %3 = vector.load %arg2[%c0, %c0_1] : memref<56x128xf32, #tpu.memory_space<vmem>>, vector<56x128xf32>
    %c0_2 = arith.constant 0 : index
    %c0_3 = arith.constant 0 : index
    %4 = vector.load %arg3[%c0_2, %c0_3] : memref<56x128xf32, #tpu.memory_space<vmem>>, vector<56x128xf32>
    %cst = arith.constant 0.000000e+00 : f32
    %5 = vector.broadcast %cst : f32 to vector<56x128xf32>
    %6 = arith.maximumf %3, %5 : vector<56x128xf32>
    %7 = arith.mulf %3, %4 : vector<56x128xf32>
    %8 = arith.subf %6, %7 : vector<56x128xf32>
    %9 = math.absf %3 : vector<56x128xf32>
    %cst_4 = arith.constant 0.000000e+00 : f32
    %10 = vector.broadcast %cst_4 : f32 to vector<56x128xf32>
    %11 = arith.subf %10, %9 : vector<56x128xf32>
    %12 = math.exp %11 : vector<56x128xf32>
    %13 = math.log1p %12 : vector<56x128xf32>
    %14 = arith.addf %8, %13 : vector<56x128xf32>
    %c1_i32 = arith.constant 1 : i32
    %15 = arith.muli %arg0, %c1_i32 : i32
    %16 = arith.addi %15, %arg1 : i32
    %c0_i32_5 = arith.constant 0 : i32
    %17 = arith.cmpi sge, %16, %c0_i32_5 : i32
    %18 = arith.extui %17 : i1 to i32
    %c0_i32_6 = arith.constant 0 : i32
    %19 = arith.cmpi ne, %18, %c0_i32_6 : i32
    scf.if %19 {
      %c56_i32 = arith.constant 56 : i32
      %23 = arith.muli %16, %c56_i32 : i32
      %24 = tpu.iota {dimensions = array<i32: 0>} : vector<56x128xi32>
      %25 = vector.broadcast %23 : i32 to vector<56x128xi32>
      %26 = arith.addi %25, %24 : vector<56x128xi32>
      %c0_9 = arith.constant 0 : index
      %c0_10 = arith.constant 0 : index
      %27 = vector.load %arg6[%c0_9, %c0_10] : memref<56x128xf32, #tpu.memory_space<vmem>>, vector<56x128xf32>
      %c7_i32 = arith.constant 7 : i32
      %28 = vector.broadcast %c7_i32 : i32 to vector<56x128xi32>
      %29 = arith.cmpi slt, %26, %28 : vector<56x128xi32>
      %cst_11 = arith.constant 0.000000e+00 : f32
      %30 = vector.broadcast %cst_11 : f32 to vector<56x128xf32>
      %31 = arith.select %29, %14, %30 : vector<56x128xi1>, vector<56x128xf32>
      %32 = arith.addf %27, %31 : vector<56x128xf32>
      %c0_12 = arith.constant 0 : index
      %c0_13 = arith.constant 0 : index
      %33 = vector.load %arg6[%c0_12, %c0_13] : memref<56x128xf32, #tpu.memory_space<vmem>>, vector<56x128xf32>
      tpu.vector_store %arg6[%c0_12, %c0_13], %32 {strides = array<i32>} : memref<56x128xf32, #tpu.memory_space<vmem>>, vector<56x128xf32>,
    } else {
    }
    %c0_i32_7 = arith.constant 0 : i32
    %20 = arith.cmpi eq, %arg1, %c0_i32_7 : i32
    %21 = arith.extui %20 : i1 to i32
    %c0_i32_8 = arith.constant 0 : i32
    %22 = arith.cmpi ne, %21, %c0_i32_8 : i32
    scf.if %22 {
      %c0_9 = arith.constant 0 : index
      %c0_10 = arith.constant 0 : index
      %23 = vector.load %arg6[%c0_9, %c0_10] : memref<56x128xf32, #tpu.memory_space<vmem>>, vector<56x128xf32>
      %c0_11 = arith.constant 0 : index
      %c0_12 = arith.constant 0 : index
      %24 = vector.load %arg4[%c0_11, %c0_12] : memref<56x128xf32, #tpu.memory_space<vmem>>, vector<56x128xf32>
      %25 = arith.mulf %23, %24 : vector<56x128xf32>
      %26 = vector.shape_cast %25 : vector<56x128xf32> to vector<1x56x128xf32>
      %cst_13 = arith.constant dense<0.000000e+00> : vector<1xf32>
      %27 = vector.multi_reduction <add>, %26, %cst_13 [1, 2] : vector<1x56x128xf32> to vector<1xf32>
      %28 = vector.shape_cast %27 : vector<1xf32> to vector<1x1x1xf32>
      %29 = vector.extract %28[0, 0, 0] : f32 from vector<1x1x1xf32>
      %c0_14 = arith.constant 0 : index
      %c0_15 = arith.constant 0 : index
      %30 = memref.load %arg5[%c0_14, %c0_15] : memref<1x1xf32, #tpu.memory_space<smem>>
      memref.store %29, %arg5[%c0_14, %c0_15] : memref<1x1xf32, #tpu.memory_space<smem>>
    } else {
    }
    return
  }
  func.func @transform_0(%arg0: i32, %arg1: i32) -> (i32, i32) {
    %c1_i32 = arith.constant 1 : i32
    %0 = arith.muli %arg0, %c1_i32 : i32
    %1 = arith.addi %0, %arg1 : i32
    %c0_i32 = arith.constant 0 : i32
    %2 = arith.minsi %1, %c0_i32 : i32
    %c0_i32_0 = arith.constant 0 : i32
    %c0_i32_1 = arith.constant 0 : i32
    return %2, %c0_i32_0 : i32, i32
  }
  func.func @transform_1(%arg0: i32, %arg1: i32) -> (i32, i32) {
    %c1_i32 = arith.constant 1 : i32
    %0 = arith.muli %arg0, %c1_i32 : i32
    %1 = arith.addi %0, %arg1 : i32
    %c0_i32 = arith.constant 0 : i32
    %2 = arith.minsi %1, %c0_i32 : i32
    %c0_i32_0 = arith.constant 0 : i32
    %c0_i32_1 = arith.constant 0 : i32
    return %2, %c0_i32_0 : i32, i32
  }
  func.func @transform_2(%arg0: i32, %arg1: i32) -> (i32, i32) {
    %c0_i32 = arith.constant 0 : i32
    %c0_i32_0 = arith.constant 0 : i32
    %c0_i32_1 = arith.constant 0 : i32
    return %c0_i32, %c0_i32_0 : i32, i32
  }
  func.func @transform_3(%arg0: i32, %arg1: i32) -> (i32, i32) {
    %c0_i32 = arith.constant 0 : i32
    %c0_i32_0 = arith.constant 0 : i32
    return %arg0, %c0_i32 : i32, i32
  }
}

</mosaic_0001>

<bundles_post_ra>
// kernel: tpu_custom_call.1
= control target key start
LH: loop header
LB: loop body
LE: loop exit
PB: predicated region body
PF: predicated region fallthrough
CT: control target
= control target key end

     0   :  { %8 = vsyncpa [#allocation4], 0  ;;  %s533_s0 = inlined_call_operand.hbm [shape: f32[7,128], index: 0, kind: input, shape index: {}]   ;;  %s534_s1 = inlined_call_operand.hbm [shape: f32[7,128], index: 1, kind: input, shape index: {}]   ;;  %s535_s2 = inlined_call_operand.hbm [shape: f32[56,128], index: 2, kind: input, shape index: {}]   ;;  %s536_s3 = inlined_call_operand.hbm [shape: f32[1,1], index: 3, kind: output, shape index: {}]  }
   0x1   :  { %9 = vsyncpa [#allocation7], 0 }
   0x2   :  { %10 = vsyncpa [#allocation5], 0 }
   0x3   :  { %21 = vsyncadd [#allocation4], 768  ;;  %s443_s12 = smov [#allocation3]   ;;  %s361_s16 = scalar_lea.hbm %s533_s0, 128 }
   0x4   :  { %s26_s13 = sshll.u32 %s443_s12, 4  ;;  %p362_p0 = scmp.ne.s32.totalorder %s533_s0, %s361_s16  ;;  %s27_s13 = int_to_ptr.vmem [resolvable:$true] %s26_s13 }
   0x5   :  { %p365_p1 = scmp.lt.u32.totalorder %s361_s16, %s533_s0 }
   0x7   :  { %p367_p2 = pnand %p365_p1, %p362_p0 }
   0x9   :  { %370 = shalt.err (!%p367_p2)
}
   0xa   :  { %s371_s21 = scalar_lea.vmem %s27_s13, 128  ;;  %s375_s22 = scalar_lea.vmem %s27_s13, 896 }
   0xb   :  { %p372_p3 = scmp.ne.s32.totalorder %s27_s13, %s371_s21  ;;  %p376_p4 = scmp.lt.s32.totalorder %s27_s13, %s27_s13 }
   0xc   :  { %p377_p5 = scmp.lt.s32.totalorder %s375_s22, %s371_s21 }
   0xe   :  { %p378_p6 = por %p377_p5, %p376_p4 }
  0x10   :  { %p379_p7 = pnand %p378_p6, %p372_p3 }
  0x12   :  { %382 = shalt.err (!%p379_p7)
}
  0x13   :  { %s444_s23 = smov 128   ;;  %s445_s24 = smov 8  }
  0x14   :  { %32 = dma.hbm_to_vmem [thread:$0]  %s533_s0, 128, %s27_s13, [#allocation4], %s444_s23, %s444_s23, %s445_s24  }
  0x15   :  { %43 = vsyncadd [#allocation7], 768  ;;  %s446_s27 = smov [#allocation6]   ;;  %s447_s29 = smov [#allocation8]  }
  0x16   :  { %s48_s28 = sshll.u32 %s446_s27, 4  ;;  %s60_s30 = sshll.u32 %s447_s29, 4  ;;  %s49_s28 = int_to_ptr.vmem [resolvable:$true] %s48_s28  ;;  %s484_s30 = int_to_ptr.vmem [resolvable:$true] %s60_s30 }
  0x17   :  { %s383_s6 = scalar_lea.hbm %s534_s1, 128 }
  0x18   :  { %p384_p8 = scmp.ne.s32.totalorder %s534_s1, %s383_s6  ;;  %p387_p9 = scmp.lt.u32.totalorder %s383_s6, %s534_s1 }
  0x1a   :  { %p389_p10 = pnand %p387_p9, %p384_p8 }
  0x1c   :  { %392 = shalt.err (!%p389_p10)
}
  0x1d   :  { %s393_s0 = scalar_lea.vmem %s49_s28, 128  ;;  %s397_s11 = scalar_lea.vmem %s49_s28, 896 }
  0x1e   :  { %p394_p11 = scmp.ne.s32.totalorder %s49_s28, %s393_s0  ;;  %p398_p12 = scmp.lt.s32.totalorder %s49_s28, %s49_s28 }
  0x1f   :  { %p399_p13 = scmp.lt.s32.totalorder %s397_s11, %s393_s0 }
  0x21   :  { %p400_p0 = por %p399_p13, %p398_p12 }
  0x23   :  { %p401_p1 = pnand %p400_p0, %p394_p11 }
  0x25   :  { %404 = shalt.err (!%p401_p1)
}
  0x26   :  { %54 = dma.hbm_to_vmem [thread:$0]  %s534_s1, 128, %s49_s28, [#allocation7], %s444_s23, %s444_s23, %s445_s24  }
  0x27   :  { %s405_s16 = scalar_lea.hbm %s535_s2, 896 }
  0x28   :  { %p406_p2 = scmp.ne.s32.totalorder %s535_s2, %s405_s16  ;;  %p409_p3 = scmp.lt.u32.totalorder %s405_s16, %s535_s2 }
  0x2a   :  { %p411_p4 = pnand %p409_p3, %p406_p2 }
  0x2c   :  { %414 = shalt.err (!%p411_p4)
}
  0x2d   :  { %s415_s21 = scalar_lea.vmem %s484_s30, 896  ;;  %p420_p6 = scmp.lt.s32.totalorder %s484_s30, %s484_s30 }
  0x2e   :  { %p416_p5 = scmp.ne.s32.totalorder %s484_s30, %s415_s21  ;;  %p421_p7 = scmp.lt.s32.totalorder %s415_s21, %s415_s21 }
  0x30   :  { %p422_p8 = por %p421_p7, %p420_p6 }
  0x32   :  { %p423_p9 = pnand %p422_p8, %p416_p5 }
  0x34   :  { %426 = shalt.err (!%p423_p9)
}
  0x35   :  { %66 = dma.hbm_to_vmem [thread:$0]  %s535_s2, 896, %s484_s30, [#allocation7], %s444_s23, %s444_s23, %s445_s24  }
  0x36   :  { %437 = dma.done.wait [#allocation4], 896  }
  0x37   :  { %438 = vsyncadd [#allocation4], 4294966400 }
  0x38   :  { %439 = dma.done.wait [#allocation7], 1792  }
  0x39   :  { %440 = vsyncadd [#allocation7], 4294965504  ;;  %v99_v0 = vld [vmem:[#allocation3] sm:$0xff]  ;;  %v106_v7 = vld [vmem:[#allocation6] sm:$0xff]  ;;  %v238_v9 = vlaneseq  ;;  %s427_s25 = scalar_lea.hbm %s536_s3, 16 }
  0x3a   :  { %v134_v1 = vand.u32 2147483647, %v99_v0  ;;  %v113_v10 = vmax.f32 %v99_v0, 0.0  ;;  %v120_v11 = vmul.f32 %v106_v7, %v99_v0  ;;  %v300_v18 = vld [vmem:[#allocation8 + $0x8] sm:$0xff]  ;;  %v299_v21 = vld [vmem:[#allocation8] sm:$0xff]  ;;  %v301_v22 = vld [vmem:[#allocation8 + $0x10] sm:$0xff]  ;;  %p428_p10 = scmp.ne.s32.totalorder %s536_s3, %s427_s25  ;;  %p431_p11 = scmp.lt.u32.totalorder %s427_s25, %s536_s3 }
  0x3b   :  { %v239_v14 = vshrl.u32 %v238_v9, 7  ;;  %v307_v23 = vmul.f32 0.0, %v300_v18  ;;  %v302_v25 = vld [vmem:[#allocation8 + $0x18] sm:$0xff]  ;;  %v308_v27 = vmul.f32 0.0, %v301_v22  ;;  %v303_v28 = vld [vmem:[#allocation8 + $0x20] sm:$0xff]  ;;  %v304_v31 = vld [vmem:[#allocation8 + $0x28] sm:$0xff] }
  0x3c   :  { %v141_v2 = vsub.f32 0.0, %v134_v1  ;;  %v127_v16 = vsub.f32 %v113_v10, %v120_v11  ;;  %v309_v29 = vmul.f32 0.0, %v302_v25  ;;  %v310_v32 = vmul.f32 0.0, %v303_v28  ;;  %v305_v34 = vld [vmem:[#allocation8 + $0x30] sm:$0xff]  ;;  %p433_p12 = pnand %p431_p11, %p428_p10 }
  0x3d   :  { %vm261_vm1 = vcmp.lt.s32.totalorder %v239_v14, 7  ;;  %v311_v35 = vmul.f32 0.0, %v304_v31  ;;  %v312_v37 = vmul.f32 0.0, %v305_v34 }
  0x3e   :  { %v148_v3 = vmul.f32 1.442695, %v141_v2 }
  0x40   :  { %357 = vpow2.f32 %v148_v3 }
  0x4a   :  { %v358_v4 = vpop.eup %357 }
  0x4b   :  { %v162_v5 = vadd.f32 1.0, %v358_v4  ;;  %v165_v6 = vmul.f32 -0.5, %v358_v4  ;;  %v168_v12 = vand.u32 2147483647, %v358_v4 }
  0x4d   :  { %359 = vlog2.f32 %v162_v5  ;;  %v166_v8 = vadd.f32 1.0, %v165_v6  ;;  %vm169_vm0 = vcmp.lt.f32.partialorder %v168_v12, 0.0004427343 }
  0x4f   :  { %v167_v13 = vmul.f32 %v358_v4, %v166_v8 }
  0x57   :  { %v360_v15 = vpop.eup %359 }
  0x58   :  { %v164_v17 = vmul.f32 0.6931472, %v360_v15 }
  0x5a   :  { %v170_v19 = vsel %vm169_vm0, %v167_v13, %v164_v17 }
  0x5b   :  { %v225_v20 = vadd.f32 %v170_v19, %v127_v16 }
  0x5d   :  { %v268_v24 = vsel %vm261_vm1, %v225_v20, 0.0 }
  0x5e   :  { %v306_v26 = vmul.f32 %v299_v21, %v268_v24 }
  0x60   :  { %v313_v30 = vadd.f32 %v307_v23, %v306_v26 }
  0x62   :  { %v314_v33 = vadd.f32 %v313_v30, %v308_v27 }
  0x64   :  { %v315_v36 = vadd.f32 %v314_v33, %v309_v29 }
  0x66   :  { %v316_v38 = vadd.f32 %v315_v36, %v310_v32 }
  0x68   :  { %v317_v39 = vadd.f32 %v316_v38, %v311_v35 }
  0x6a   :  { %v318_v40 = vadd.f32 %v317_v39, %v312_v37 }
  0x6c   :  { %319 = vadd.xlane.f32.xlu0 %v318_v40 }
  0xf9   :  { %v320_v41 = vpop.xlane.xlu0 %319 }
  0xfa   :  { %v321_v42 = vrot.slane %v320_v41, 4 }
  0xfc   :  { %v322_v43 = vadd.f32 %v321_v42, %v320_v41 }
  0xfe   :  { %v323_v44 = vrot.slane %v322_v43, 2 }
 0x100   :  { %v324_v45 = vadd.f32 %v323_v44, %v322_v43 }
 0x102   :  { %v325_v46 = vrot.slane %v324_v45, 1 }
 0x104   :  { %v326_v47 = vadd.f32 %v325_v46, %v324_v45 }
 0x106   :  { %349 = vpush %v326_v47 }
 0x137   :  { %s350_s2 = spop %349 }
 0x138   :  { %329 = sst [smem:[#allocation9]] %s350_s2 }
 0x139   :  { %436 = shalt.err (!%p433_p12)
}
 0x13a   :  { %s448_s30 = smov [#allocation9]  }
 0x13b   :  { %337 = dma.smem_to_hbm %s448_s30, 16, %s536_s3, [#allocation5]  }
 0x13c   :  { %441 = dma.done.wait [#allocation5], 16  }
 0x13d   :  { %442 = vsyncadd [#allocation5], 4294967280 }
 0x13e   :  { %341 = sfence }
 0x13f   :  { %342 = vsyncpa [#allocation4], 1 }
 0x140   :  { %343 = vsyncpa [#allocation7], 1 }
 0x141   :  { %344 = vsyncpa [#allocation5], 1 }

</bundles_post_ra>
